<compile_context>
chip_gen: v6e
topology: v6e:2x2x1
jax: 0.10.0
libtpu: 0.0.40
codegen_flags: <defaults>
</compile_context>

<pallas_src>
import functools

import jax
import jax.numpy as jnp
from jax.experimental import pallas as pl
from jax.experimental.pallas import tpu as pltpu

LANE = 128          # TPU lane width; packed weight feature axes are padded to this.
SUBLANE = 8         # sublane granule; batch tiles and z-pad are multiples of this.
HIDDEN = (20, 30, 40)


def _round_up(n, m):
    return ((n + m - 1) // m) * m


def _decoder_kernel(x_ref, w_ref, b_ref, o_ref, *, z_pad, x_dim):
    # x_ref: (TB, z_pad)  w_ref: (4, 128, 128)  b_ref: (4, 1, 128)  o_ref: (TB, x_dim)
    # Zero-padded lanes/rows contribute exact zeros, so results match the unpadded MLP.
    h = x_ref[...]
    # Layer 1: Linear(z_dim, 20) + ReLU — contract only the z_pad live rows of W1.
    h = jnp.maximum(
        jnp.dot(h, w_ref[0, :z_pad, :], preferred_element_type=jnp.float32)
        + b_ref[0], 0.0)
    # Layer 2: Linear(20, 30) + ReLU
    h = jnp.maximum(
        jnp.dot(h, w_ref[1], preferred_element_type=jnp.float32) + b_ref[1], 0.0)
    # Layer 3: Linear(30, 40) + ReLU
    h = jnp.maximum(
        jnp.dot(h, w_ref[2], preferred_element_type=jnp.float32) + b_ref[2], 0.0)
    # Layer 4: Linear(40, x_dim)  (no activation)
    h = jnp.dot(h, w_ref[3], preferred_element_type=jnp.float32) + b_ref[3]
    # Store only the live x_dim lanes: masked vst in VMEM, but the HBM writeback
    # moves x_dim lanes instead of 128 and no wrapper-side crop copy is needed.
    o_ref[...] = h[:, :x_dim].astype(o_ref.dtype)


def pack_decoder_params(params):
    """Pack [(W,b)]*4 (W=(in,out), b=(1,out)) into aligned slabs:
       W_packed (4,128,128), b_packed (4,1,128), zero padded."""
    w_packed = jnp.zeros((4, LANE, LANE), jnp.float32)
    b_packed = jnp.zeros((4, 1, LANE), jnp.float32)
    for k, (w, b) in enumerate(params):
        fin, fout = w.shape
        assert fin <= LANE and fout <= LANE, "uniform pack needs in/out dims <= 128"
        w_packed = w_packed.at[k, :fin, :fout].set(w.astype(jnp.float32))
        b_packed = b_packed.at[k, 0, :fout].set(b.reshape(-1).astype(jnp.float32))
    return w_packed, b_packed


def decoder_forward(x, params, *, tb=4096):
    """x: (batch, z_dim) float32; params: list of 4 (W, b), W=(in,out), b=(1,out)."""
    batch, z_dim = x.shape
    x_dim = params[-1][0].shape[1]
    assert z_dim <= LANE and x_dim <= LANE

    w_packed, b_packed = pack_decoder_params(params)

    # Pad z only to the sublane granule (8), not to 128: cuts input HBM traffic by
    # 128/z_pad vs. a full-lane pad while keeping the x block's last dim equal to the
    # array's last dim (contiguous DMA, legal BlockSpec).
    z_pad = _round_up(z_dim, SUBLANE)
    x_f32 = x.astype(jnp.float32)
    x_in = x_f32 if z_pad == z_dim else jnp.pad(x_f32, ((0, 0), (0, z_pad - z_dim)))

    # Batch tile: multiple of 8 sublanes, big enough to amortize the ~0.35 us/step
    # pipeline overhead, and capped at ~batch/2 so grid >= 2 and both v7x TensorCores
    # get work (negligible extra cost on v5e/v6e).  Per-step footprint (double-
    # buffered in/out tiles + (TB,128) f32 intermediates) stays well under the
    # v5e 16 MiB scoped-VMEM default even at TB=4096.
    tb = max(SUBLANE, min(tb,
                          _round_up(batch, SUBLANE),
                          _round_up(pl.cdiv(batch, 2), SUBLANE)))
    grid = (pl.cdiv(batch, tb),)

    kernel = functools.partial(_decoder_kernel, z_pad=z_pad, x_dim=x_dim)

    out = pl.pallas_call(
        kernel,
        out_shape=jax.ShapeDtypeStruct((batch, x_dim), jnp.float32),
        grid=grid,
        in_specs=[
            pl.BlockSpec((tb, z_pad), lambda i: (i, 0)),          # x tile (pipelined)
            pl.BlockSpec((4, LANE, LANE), lambda i: (0, 0, 0)),   # weights (resident)
            pl.BlockSpec((4, 1, LANE), lambda i: (0, 0, 0)),      # biases  (resident)
        ],
        out_specs=pl.BlockSpec((tb, x_dim), lambda i: (i, 0)),    # write x_dim lanes
        compiler_params=pltpu.CompilerParams(
            dimension_semantics=("parallel",)),                   # megacore on v7x
    )(x_in, w_packed, b_packed)

    return out


def init_decoder_params(key, x_dim, z_dim):
    """PyTorch-style uniform(-1/sqrt(fan_in), 1/sqrt(fan_in)) init, W=(in,out), b=(1,out)."""
    dims = [z_dim, *HIDDEN, x_dim]
    params = []
    for i in range(4):
        fan_in, fan_out = dims[i], dims[i + 1]
        key, kw, kb = jax.random.split(key, 3)
        bound = 1.0 / jnp.sqrt(jnp.float32(fan_in))
        w = jax.random.uniform(kw, (fan_in, fan_out), jnp.float32, -bound, bound)
        b = jax.random.uniform(kb, (1, fan_out), jnp.float32, -bound, bound)
        params.append((w, b))
    return params


def decoder_reference(x, params):
    """Plain-JAX reference of the same forward pass (sanity check)."""
    (w1, b1), (w2, b2), (w3, b3), (w4, b4) = params
    h = jnp.maximum(x @ w1 + b1, 0.0)
    h = jnp.maximum(h @ w2 + b2, 0.0)
    h = jnp.maximum(h @ w3 + b3, 0.0)
    return h @ w4 + b4


if __name__ == "__main__":
    key = jax.random.PRNGKey(0)
    batch, z_dim, x_dim = 96, 8, 16   # small demo shapes; tb clamps to 48, grid=(2,)

    key, kx = jax.random.split(key)
    x = jax.random.normal(kx, (batch, z_dim), jnp.float32)
    params = init_decoder_params(key, x_dim=x_dim, z_dim=z_dim)

    out = decoder_forward(x, params)
    out = jax.block_until_ready(out)

    ref = decoder_reference(x, params)
    assert out.shape == (batch, x_dim), out.shape
    assert jnp.allclose(out, ref, atol=1e-5, rtol=1e-5), "mismatch vs reference"

    print("KERNEL_OK")
</pallas_src>

<mosaic_0001>
module attributes {stable_mosaic.version = 11 : i64} {
  func.func @_decoder_kernel(%arg0: i32, %arg1: memref<48x8xf32, #tpu.memory_space<vmem>>, %arg2: memref<4x128x128xf32, #tpu.memory_space<vmem>>, %arg3: memref<4x1x128xf32, #tpu.memory_space<vmem>>, %arg4: memref<48x16xf32, #tpu.memory_space<vmem>>) attributes {dimension_semantics = [#tpu.dimension_semantics<parallel>], iteration_bounds = array<i64: 2>, scalar_prefetch = 0 : i64, scratch_operands = 0 : i64, tpu.core_type = #tpu.core_type<tc>, window_params = [{transform_indices = @transform_0, window_bounds = array<i64: 48, 8>}, {pipeline_mode = #tpu.pipeline_mode<synchronous>, transform_indices = @transform_1, window_bounds = array<i64: 4, 128, 128>}, {pipeline_mode = #tpu.pipeline_mode<synchronous>, transform_indices = @transform_2, window_bounds = array<i64: 4, 1, 128>}, {transform_indices = @transform_3, window_bounds = array<i64: 48, 16>}]} {
    %c0 = arith.constant 0 : index
    %c0_0 = arith.constant 0 : index
    %0 = vector.load %arg1[%c0, %c0_0] : memref<48x8xf32, #tpu.memory_space<vmem>>, vector<48x8xf32>
    %c0_1 = arith.constant 0 : index
    %c0_2 = arith.constant 0 : index
    %c0_3 = arith.constant 0 : index
    %1 = vector.load %arg2[%c0_1, %c0_2, %c0_3] : memref<4x128x128xf32, #tpu.memory_space<vmem>>, vector<1x8x128xf32>
    %2 = vector.shape_cast %1 : vector<1x8x128xf32> to vector<8x128xf32>
    %cst = arith.constant dense<0.000000e+00> : vector<48x128xf32>
    %3 = tpu.matmul %0, %2, %cst {dimension_numbers = #tpu.dot_dimension_numbers<[1], [0], [0], [1], [0, 0, 1, 1], [], []>} : vector<48x8xf32>, vector<8x128xf32>, vector<48x128xf32> -> vector<48x128xf32>
    %c0_4 = arith.constant 0 : index
    %c0_5 = arith.constant 0 : index
    %c0_6 = arith.constant 0 : index
    %4 = vector.load %arg3[%c0_4, %c0_5, %c0_6] : memref<4x1x128xf32, #tpu.memory_space<vmem>>, vector<1x1x128xf32>
    %5 = vector.shape_cast %4 : vector<1x1x128xf32> to vector<1x128xf32>
    %6 = vector.broadcast %5 : vector<1x128xf32> to vector<48x128xf32>
    %7 = arith.addf %3, %6 : vector<48x128xf32>
    %cst_7 = arith.constant 0.000000e+00 : f32
    %8 = vector.broadcast %cst_7 : f32 to vector<48x128xf32>
    %9 = arith.maximumf %7, %8 : vector<48x128xf32>
    %c1 = arith.constant 1 : index
    %c0_8 = arith.constant 0 : index
    %c0_9 = arith.constant 0 : index
    %10 = vector.load %arg2[%c1, %c0_8, %c0_9] : memref<4x128x128xf32, #tpu.memory_space<vmem>>, vector<1x128x128xf32>
    %11 = vector.shape_cast %10 : vector<1x128x128xf32> to vector<128x128xf32>
    %cst_10 = arith.constant dense<0.000000e+00> : vector<48x128xf32>
    %12 = tpu.matmul %9, %11, %cst_10 {dimension_numbers = #tpu.dot_dimension_numbers<[1], [0], [0], [1], [0, 0, 1, 1], [], []>} : vector<48x128xf32>, vector<128x128xf32>, vector<48x128xf32> -> vector<48x128xf32>
    %c1_11 = arith.constant 1 : index
    %c0_12 = arith.constant 0 : index
    %c0_13 = arith.constant 0 : index
    %13 = vector.load %arg3[%c1_11, %c0_12, %c0_13] : memref<4x1x128xf32, #tpu.memory_space<vmem>>, vector<1x1x128xf32>
    %14 = vector.shape_cast %13 : vector<1x1x128xf32> to vector<1x128xf32>
    %15 = vector.broadcast %14 : vector<1x128xf32> to vector<48x128xf32>
    %16 = arith.addf %12, %15 : vector<48x128xf32>
    %cst_14 = arith.constant 0.000000e+00 : f32
    %17 = vector.broadcast %cst_14 : f32 to vector<48x128xf32>
    %18 = arith.maximumf %16, %17 : vector<48x128xf32>
    %c2 = arith.constant 2 : index
    %c0_15 = arith.constant 0 : index
    %c0_16 = arith.constant 0 : index
    %19 = vector.load %arg2[%c2, %c0_15, %c0_16] : memref<4x128x128xf32, #tpu.memory_space<vmem>>, vector<1x128x128xf32>
    %20 = vector.shape_cast %19 : vector<1x128x128xf32> to vector<128x128xf32>
    %cst_17 = arith.constant dense<0.000000e+00> : vector<48x128xf32>
    %21 = tpu.matmul %18, %20, %cst_17 {dimension_numbers = #tpu.dot_dimension_numbers<[1], [0], [0], [1], [0, 0, 1, 1], [], []>} : vector<48x128xf32>, vector<128x128xf32>, vector<48x128xf32> -> vector<48x128xf32>
    %c2_18 = arith.constant 2 : index
    %c0_19 = arith.constant 0 : index
    %c0_20 = arith.constant 0 : index
    %22 = vector.load %arg3[%c2_18, %c0_19, %c0_20] : memref<4x1x128xf32, #tpu.memory_space<vmem>>, vector<1x1x128xf32>
    %23 = vector.shape_cast %22 : vector<1x1x128xf32> to vector<1x128xf32>
    %24 = vector.broadcast %23 : vector<1x128xf32> to vector<48x128xf32>
    %25 = arith.addf %21, %24 : vector<48x128xf32>
    %cst_21 = arith.constant 0.000000e+00 : f32
    %26 = vector.broadcast %cst_21 : f32 to vector<48x128xf32>
    %27 = arith.maximumf %25, %26 : vector<48x128xf32>
    %c3 = arith.constant 3 : index
    %c0_22 = arith.constant 0 : index
    %c0_23 = arith.constant 0 : index
    %28 = vector.load %arg2[%c3, %c0_22, %c0_23] : memref<4x128x128xf32, #tpu.memory_space<vmem>>, vector<1x128x128xf32>
    %29 = vector.shape_cast %28 : vector<1x128x128xf32> to vector<128x128xf32>
    %cst_24 = arith.constant dense<0.000000e+00> : vector<48x128xf32>
    %30 = tpu.matmul %27, %29, %cst_24 {dimension_numbers = #tpu.dot_dimension_numbers<[1], [0], [0], [1], [0, 0, 1, 1], [], []>} : vector<48x128xf32>, vector<128x128xf32>, vector<48x128xf32> -> vector<48x128xf32>
    %c3_25 = arith.constant 3 : index
    %c0_26 = arith.constant 0 : index
    %c0_27 = arith.constant 0 : index
    %31 = vector.load %arg3[%c3_25, %c0_26, %c0_27] : memref<4x1x128xf32, #tpu.memory_space<vmem>>, vector<1x1x128xf32>
    %32 = vector.shape_cast %31 : vector<1x1x128xf32> to vector<1x128xf32>
    %33 = vector.broadcast %32 : vector<1x128xf32> to vector<48x128xf32>
    %34 = arith.addf %30, %33 : vector<48x128xf32>
    %35 = vector.extract_strided_slice %34 {offsets = [0, 0], sizes = [48, 16], strides = [1, 1]} : vector<48x128xf32> to vector<48x16xf32>
    %c0_28 = arith.constant 0 : index
    %c0_29 = arith.constant 0 : index
    %36 = vector.load %arg4[%c0_28, %c0_29] : memref<48x16xf32, #tpu.memory_space<vmem>>, vector<48x16xf32>
    tpu.vector_store %arg4[%c0_28, %c0_29], %35 {strides = array<i32>} : memref<48x16xf32, #tpu.memory_space<vmem>>, vector<48x16xf32>,
    return
  }
  func.func @transform_0(%arg0: i32) -> (i32, i32) {
    %c0_i32 = arith.constant 0 : i32
    %c0_i32_0 = arith.constant 0 : i32
    return %arg0, %c0_i32 : i32, i32
  }
  func.func @transform_1(%arg0: i32) -> (i32, i32, i32) {
    %c0_i32 = arith.constant 0 : i32
    %c0_i32_0 = arith.constant 0 : i32
    %c0_i32_1 = arith.constant 0 : i32
    %c0_i32_2 = arith.constant 0 : i32
    return %c0_i32, %c0_i32_0, %c0_i32_1 : i32, i32, i32
  }
  func.func @transform_2(%arg0: i32) -> (i32, i32, i32) {
    %c0_i32 = arith.constant 0 : i32
    %c0_i32_0 = arith.constant 0 : i32
    %c0_i32_1 = arith.constant 0 : i32
    %c0_i32_2 = arith.constant 0 : i32
    return %c0_i32, %c0_i32_0, %c0_i32_1 : i32, i32, i32
  }
  func.func @transform_3(%arg0: i32) -> (i32, i32) {
    %c0_i32 = arith.constant 0 : i32
    %c0_i32_0 = arith.constant 0 : i32
    return %arg0, %c0_i32 : i32, i32
  }
}

</mosaic_0001>

<bundles_post_ra>
// kernel: tpu_custom_call.1
= control target key start
LH: loop header
LB: loop body
LE: loop exit
PB: predicated region body
PF: predicated region fallthrough
CT: control target
= control target key end

     0   :  { %8 = vsyncpa [#allocation3], 0  ;;  %s1115_s12 = smov 0   ;;  %s1184_s0 = inlined_call_operand.vmem [shape: f32[96,8], index: 0, kind: input, shape index: {}]   ;;  %s1185_s1 = inlined_call_operand.hbm [shape: f32[4,128,128], index: 1, kind: input, shape index: {}]   ;;  %s1186_s2 = inlined_call_operand.vmem [shape: f32[4,1,128], index: 2, kind: input, shape index: {}]   ;;  %s1187_s3 = inlined_call_operand.vmem [shape: f32[96,16], index: 3, kind: output, shape index: {}]  }
   0x1 LB: > { %s770_s13 = sadd.s32 4294967295, %s1090_s12   ;;  %p772_p0 = scmp.ge.s32.totalorder %s1090_s12, 1  ;;  %s1090_s12 = sphi %s1115_s12, %s14_s12  }
   0x2   : > { %p113_p1 = scmp.lt.s32.totalorder %s1090_s12, 3  ;;  %s1092_s14 = smov [#allocation2]  }
   0x3   : > { %s125_s15 = sshll.u32 %s1092_s14, 4  ;;  %p1127_p3 = scmp.eq.s32.totalorder %s770_s13, 0  ;;  %s126_s15 = int_to_ptr.vmem [resolvable:$true] %s125_s15 }
   0x4   : > { %p1123_p2 = pnand %p772_p0, %p113_p1  ;;  %s1065_s18 = scalar_lea.vmem %s126_s15, 8192 }
   0x5   : > { %p1066_p7 = scmp.ne.s32.totalorder %s126_s15, %s1065_s18  ;;  %p1073_p10 = scmp.lt.s32.totalorder %s126_s15, %s126_s15 }
   0x6   : > { %p1037_p4 = pneg %p1123_p2  ;;  %p1074_p11 = scmp.lt.s32.totalorder %s1065_s18, %s1065_s18 }
   0x8   : > { %p1038_p5 = pnand %p1127_p3, %p1037_p4  ;;  %p1075_p12 = por %p1074_p11, %p1073_p10 }
   0xa   : > { %p1056_p6 = pneg %p1038_p5 }
   0xc   : > { %p1068_p8 = pnand %p1066_p7, %p1056_p6 }
   0xe   : > { %p1069_p9 = pneg %p1068_p8 }
  0x10   : > { %p1076_p13 = pnand %p1075_p12, %p1069_p9 }
  0x12   : > { %1079 = shalt.err (!%p1076_p13)
}
  0x13   : > { %s1093_s19 = smov 128   ;;  %s1094_s20 = smov 8  }
  0x14   : > { %1040 = dma.hbm_to_vmem [thread:$0]  (!%p1038_p5), %s1185_s1, 8192, %s126_s15, [#allocation3], %s1093_s19, %s1093_s19, %s1094_s20  }
  0x15   : > { %153 = sbr.rel (%p1123_p2) target bundleno = 842 (0x34a), region = 32 }
  0x1a   : > { %1085 = dma.done.wait (%p1127_p3), [#allocation3], 8192  }
  0x1b   : > { %1087 = vsyncadd (%p1127_p3), [#allocation3], 4294959104  ;;  %s177_s23 = smul.u32 6, %s770_s13  ;;  %vm203_vm0 = vcmask 64512   ;;  %v195_v0 = vld [vmem:[#allocation2] sm:$0xff]  ;;  %v339_v1 = vld [vmem:[#allocation2 + $0xf8] sm:$0xff] }
  0x1c   : > { %v338_v2 = vld [vmem:[#allocation2 + $0xf0] sm:$0xff]  ;;  %867 = vmatprep.subr.mxu0 %v195_v0  ;;  %878 = vmatprep.subr.mxu1 %v339_v1  ;;  %v337_v6 = vld [vmem:[#allocation2 + $0xe8] sm:$0xff]  ;;  %v336_v9 = vld [vmem:[#allocation2 + $0xe0] sm:$0xff]  ;;  %vm695_vm1 = vcmask 130048  }
  0x1d   : > { %p178_p0 = scmp.lt.s32.totalorder %s177_s23, 11  ;;  %868 = vmatpush3.msra.mxu0 %v195_v0  ;;  %879 = vmatpush3.msra.mxu1 %v339_v1  ;;  %v335_v10 = vld [vmem:[#allocation2 + $0xd8] sm:$0xff]  ;;  %v334_v12 = vld [vmem:[#allocation2 + $0xd0] sm:$0xff]  ;;  %v333_v13 = vld [vmem:[#allocation2 + $0xc8] sm:$0xff] }
  0x1e   : > { %880 = vmatprep.subr.mxu1 %v338_v2  ;;  %v332_v14 = vld [vmem:[#allocation2 + $0xc0] sm:$0xff]  ;;  %v331_v15 = vld [vmem:[#allocation2 + $0xb8] sm:$0xff]  ;;  %v330_v16 = vld [vmem:[#allocation2 + $0xb0] sm:$0xff] }
  0x1f   : > { %s1191_s23 = smov (!%p178_p0, %s177_s23), 11  ;;  %881 = vmatpush3.msra.mxu1 %v338_v2  ;;  %v329_v17 = vld [vmem:[#allocation2 + $0xa8] sm:$0xff]  ;;  %v328_v18 = vld [vmem:[#allocation2 + $0xa0] sm:$0xff]  ;;  %v327_v19 = vld [vmem:[#allocation2 + $0x98] sm:$0xff] }
  0x20   : > { %s777_s24 = sshll.u32 %s1191_s23, 3  ;;  %882 = vmatprep.subr.mxu1 %v337_v6  ;;  %v326_v20 = vld [vmem:[#allocation2 + $0x90] sm:$0xff]  ;;  %v325_v21 = vld [vmem:[#allocation2 + $0x88] sm:$0xff]  ;;  %v324_v22 = vld [vmem:[#allocation2 + $0x80] sm:$0xff] }
  0x21   : > { %s181_s27 = scalar_lea.vmem %s1184_s0, %s777_s24  ;;  %883 = vmatpush3.msra.mxu1 %v337_v6  ;;  %v465_v23 = vld [vmem:[#allocation2 + $0x178] sm:$0xff]  ;;  %v464_v24 = vld [vmem:[#allocation2 + $0x170] sm:$0xff]  ;;  %v463_v25 = vld [vmem:[#allocation2 + $0x168] sm:$0xff]  ;;  %s187_s11 = scalar_lea.vmem %s1187_s3, %s777_s24 }
  0x22   : > { %v189_v3 = vld [vmem:[%s181_s27] sm:$0xff]  ;;  %v190_v4 = vld [vmem:[%s181_s27 + $0x8] sm:$0xff]  ;;  %v191_v5 = vld [vmem:[%s181_s27 + $0x10] sm:$0xff]  ;;  %884 = vmatprep.subr.mxu1 %v336_v9  ;;  %919 = vmatprep.subr.mxu0 %v465_v23 }
  0x23   : > { %869 = vmatprep.mubr.msk.f32.mxu0 %vm203_vm0, %v189_v3  ;;  %v192_v7 = vld [vmem:[%s181_s27 + $0x18] sm:$0xff]  ;;  %v193_v8 = vld [vmem:[%s181_s27 + $0x20] sm:$0xff]  ;;  %v194_v11 = vld [vmem:[%s181_s27 + $0x28] sm:$0xff]  ;;  %885 = vmatpush3.msra.mxu1 %v336_v9 }
  0x24   : > { %870 = vmatmul.mubr.msk.f32.vlgmr.msra.gmra.mxu0 %vm203_vm0, %v190_v4  ;;  %886 = vmatprep.subr.mxu1 %v335_v10  ;;  %v462_v26 = vld [vmem:[#allocation2 + $0x160] sm:$0xff]  ;;  %v461_v27 = vld [vmem:[#allocation2 + $0x158] sm:$0xff]  ;;  %v460_v28 = vld [vmem:[#allocation2 + $0x150] sm:$0xff] }
  0x25   : > { %872 = vmatprep.mubr.msk.f32.mxu0 %vm203_vm0, %v191_v5  ;;  %887 = vmatpush3.msra.mxu1 %v335_v10  ;;  %v459_v29 = vld [vmem:[#allocation2 + $0x148] sm:$0xff]  ;;  %v458_v30 = vld [vmem:[#allocation2 + $0x140] sm:$0xff]  ;;  %v457_v31 = vld [vmem:[#allocation2 + $0x138] sm:$0xff] }
  0x26   : > { %888 = vmatprep.subr.mxu1 %v334_v12  ;;  %920 = vmatpush3.msra.mxu0 %v465_v23  ;;  %v456_v32 = vld [vmem:[#allocation2 + $0x130] sm:$0xff]  ;;  %v455_v33 = vld [vmem:[#allocation2 + $0x128] sm:$0xff]  ;;  %v454_v34 = vld [vmem:[#allocation2 + $0x120] sm:$0xff] }
  0x27   : > { %889 = vmatpush3.msra.mxu1 %v334_v12  ;;  %921 = vmatprep.subr.mxu0 %v464_v24  ;;  %v779_v35 = vld [vmem:[%s1186_s2] ss:$0 sm:$0xff]  ;;  %v453_v54 = vld [vmem:[#allocation2 + $0x118] sm:$0xff]  ;;  %v452_v55 = vld [vmem:[#allocation2 + $0x110] sm:$0xff] }
  0x28   : > { %873 = vmatmul.mubr.msk.f32.gmra.mxu0 %vm203_vm0, %v192_v7  ;;  %890 = vmatprep.subr.mxu1 %v333_v13  ;;  %v451_v56 = vld [vmem:[#allocation2 + $0x108] sm:$0xff]  ;;  %v450_v57 = vld [vmem:[#allocation2 + $0x100] sm:$0xff]  ;;  %v591_v58 = vld [vmem:[#allocation2 + $0x1f8] sm:$0xff] }
  0x29   : > { %875 = vmatprep.mubr.msk.f32.mxu0 %vm203_vm0, %v193_v8  ;;  %891 = vmatpush3.msra.mxu1 %v333_v13  ;;  %v590_v59 = vld [vmem:[#allocation2 + $0x1f0] sm:$0xff]  ;;  %v589_v60 = vld [vmem:[#allocation2 + $0x1e8] sm:$0xff]  ;;  %v588_v61 = vld [vmem:[#allocation2 + $0x1e0] sm:$0xff] }
  0x2a   : > { %892 = vmatprep.subr.mxu1 %v332_v14  ;;  %922 = vmatpush3.msra.mxu0 %v464_v24  ;;  %v587_v62 = vld [vmem:[#allocation2 + $0x1d8] sm:$0xff]  ;;  %v586_v63 = vld [vmem:[#allocation2 + $0x1d0] sm:$0xff]  ;;  %v585_v0 = vld [vmem:[#allocation2 + $0x1c8] sm:$0xff] }
  0x2b   : > { %893 = vmatpush3.msra.mxu1 %v332_v14  ;;  %923 = vmatprep.subr.mxu0 %v463_v25  ;;  %v584_v1 = vld [vmem:[#allocation2 + $0x1c0] sm:$0xff]  ;;  %v583_v2 = vld [vmem:[#allocation2 + $0x1b8] sm:$0xff]  ;;  %v582_v3 = vld [vmem:[#allocation2 + $0x1b0] sm:$0xff] }
  0x2c   : > { %876 = vmatmul.mubr.msk.f32.gmra.mxu0 %vm203_vm0, %v194_v11  ;;  %894 = vmatprep.subr.mxu1 %v331_v15  ;;  %v581_v4 = vld [vmem:[#allocation2 + $0x1a8] sm:$0xff]  ;;  %v580_v5 = vld [vmem:[#allocation2 + $0x1a0] sm:$0xff] }
  0x2d   : > { %895 = vmatpush3.msra.mxu1 %v331_v15  ;;  %924 = vmatpush3.msra.mxu0 %v463_v25  ;;  %v787_v6 = vld [vmem:[%s1186_s2 + $0x1] ss:$0 sm:$0xff]  ;;  %v579_v25 = vld [vmem:[#allocation2 + $0x198] sm:$0xff] }
  0x2e   : > { %896 = vmatprep.subr.mxu1 %v330_v16  ;;  %925 = vmatprep.subr.mxu0 %v462_v26 }
  0x2f   : > { %897 = vmatpush3.msra.mxu1 %v330_v16  ;;  %926 = vmatpush3.msra.mxu0 %v462_v26  ;;  %v578_v26 = vld [vmem:[#allocation2 + $0x190] sm:$0xff] }
  0x30   : > { %898 = vmatprep.subr.mxu1 %v329_v17  ;;  %927 = vmatprep.subr.mxu0 %v461_v27 }
  0x31   : > { %899 = vmatpush3.msra.mxu1 %v329_v17  ;;  %928 = vmatpush3.msra.mxu0 %v461_v27  ;;  %v577_v27 = vld [vmem:[#allocation2 + $0x188] sm:$0xff] }
  0x32   : > { %900 = vmatprep.subr.mxu1 %v328_v18  ;;  %929 = vmatprep.subr.mxu0 %v460_v28 }
  0x33   : > { %901 = vmatpush3.msra.mxu1 %v328_v18  ;;  %930 = vmatpush3.msra.mxu0 %v460_v28  ;;  %v576_v28 = vld [vmem:[#allocation2 + $0x180] sm:$0xff] }
  0x34   : > { %902 = vmatprep.subr.mxu1 %v327_v19  ;;  %931 = vmatprep.subr.mxu0 %v459_v29 }
  0x35   : > { %903 = vmatpush3.msra.mxu1 %v327_v19  ;;  %932 = vmatpush3.msra.mxu0 %v459_v29  ;;  %v789_v29 = vld [vmem:[%s1186_s2 + $0x2] ss:$0 sm:$0xff] }
  0x36   : > { %904 = vmatprep.subr.mxu1 %v326_v20  ;;  %933 = vmatprep.subr.mxu0 %v458_v30 }
  0x37   : > { %905 = vmatpush3.msra.mxu1 %v326_v20  ;;  %934 = vmatpush3.msra.mxu0 %v458_v30 }
  0x38   : > { %906 = vmatprep.subr.mxu1 %v325_v21  ;;  %935 = vmatprep.subr.mxu0 %v457_v31 }
  0x39   : > { %907 = vmatpush3.msra.mxu1 %v325_v21  ;;  %936 = vmatpush3.msra.mxu0 %v457_v31 }
  0x3a   : > { %908 = vmatprep.subr.mxu1 %v324_v22  ;;  %937 = vmatprep.subr.mxu0 %v456_v32 }
  0x3b   : > { %909 = vmatpush3.msra.mxu1 %v324_v22  ;;  %938 = vmatpush3.msra.mxu0 %v456_v32 }
  0x3c   : > { %939 = vmatprep.subr.mxu0 %v455_v33  ;;  %1001 = vmatprep.subr.mxu1 %v591_v58 }
  0x3d   : > { %940 = vmatpush3.msra.mxu0 %v455_v33 }
  0x3e   : > { %941 = vmatprep.subr.mxu0 %v454_v34 }
  0x3f   : > { %942 = vmatpush3.msra.mxu0 %v454_v34 }
  0x40   : > { %943 = vmatprep.subr.mxu0 %v453_v54 }
  0x41   : > { %944 = vmatpush3.msra.mxu0 %v453_v54 }
  0x42   : > { %945 = vmatprep.subr.mxu0 %v452_v55 }
  0x43   : > { %946 = vmatpush3.msra.mxu0 %v452_v55 }
  0x44   : > { %947 = vmatprep.subr.mxu0 %v451_v56 }
  0x45   : > { %948 = vmatpush3.msra.mxu0 %v451_v56 }
  0x46   : > { %949 = vmatprep.subr.mxu0 %v450_v57 }
  0x47   : > { %950 = vmatpush3.msra.mxu0 %v450_v57 }
  0x48   : > { %960 = vmatprep.subr.mxu0 %v591_v58 }
  0xe4   : > { %v871_v36 = vpop.f32.mrf.mxu0 }
  0xe5   : > { %v294_v37 = vadd.f32 %v871_v36, %v779_v35 }
  0xe6   : > { %v288_v38 = vpop.f32.mrf.mxu0 }
  0xe7   : > { %v289_v39 = vadd.f32 %v779_v35, %v288_v38  ;;  %v318_v42 = vmax.f32 %v294_v37, 0.0 }
  0xe8   : > { %v874_v40 = vpop.f32.mrf.mxu0 }
  0xe9   : > { %v317_v41 = vmax.f32 %v289_v39, 0.0  ;;  %v304_v43 = vadd.f32 %v874_v40, %v779_v35 }
  0xea   : > { %v298_v44 = vpop.f32.mrf.mxu0 }
  0xeb   : > { %v299_v45 = vadd.f32 %v779_v35, %v298_v44  ;;  %910 = vmatprep.mubr.f32.mxu1 %v317_v41  ;;  %v320_v48 = vmax.f32 %v304_v43, 0.0 }
  0xec   : > { %v877_v46 = vpop.f32.mrf.mxu0  ;;  %911 = vmatmul.mubr.f32.vlgmr.msra.gmra.mxu1 %v318_v42 }
  0xed   : > { %v319_v47 = vmax.f32 %v299_v45, 0.0  ;;  %v314_v49 = vadd.f32 %v877_v46, %v779_v35  ;;  %1017 = vmatpush3.msra.mxu1 %v591_v58 }
  0xee   : > { %v308_v50 = vpop.f32.mrf.mxu0  ;;  %1002 = vmatprep.subr.mxu1 %v590_v59 }
  0xef   : > { %v309_v51 = vadd.f32 %v779_v35, %v308_v50  ;;  %913 = vmatprep.mubr.f32.mxu1 %v319_v47  ;;  %v322_v53 = vmax.f32 %v314_v49, 0.0  ;;  %1018 = vmatpush3.msra.mxu1 %v590_v59 }
  0xf0   : > { %914 = vmatmul.mubr.f32.gmra.mxu1 %v320_v48  ;;  %1003 = vmatprep.subr.mxu1 %v589_v60  ;;  %v791_v48 = vld [vmem:[%s1186_s2 + $0x3] ss:$0 sm:$0xff] }
  0xf1   : > { %v321_v52 = vmax.f32 %v309_v51, 0.0  ;;  %1019 = vmatpush3.msra.mxu1 %v589_v60 }
  0xf2   : > { %1004 = vmatprep.subr.mxu1 %v588_v61 }
  0xf3   : > { %916 = vmatprep.mubr.f32.mxu1 %v321_v52  ;;  %1020 = vmatpush3.msra.mxu1 %v588_v61 }
  0xf4   : > { %917 = vmatmul.mubr.f32.gmra.mxu1 %v322_v53  ;;  %1005 = vmatprep.subr.mxu1 %v587_v62 }
  0xf5   : > { %1021 = vmatpush3.msra.mxu1 %v587_v62 }
  0xf6   : > { %1006 = vmatprep.subr.mxu1 %v586_v63 }
  0xf7   : > { %1022 = vmatpush3.msra.mxu1 %v586_v63 }
  0xf8   : > { %1007 = vmatprep.subr.mxu1 %v585_v0 }
  0xf9   : > { %1023 = vmatpush3.msra.mxu1 %v585_v0 }
  0xfa   : > { %1008 = vmatprep.subr.mxu1 %v584_v1 }
  0xfb   : > { %1024 = vmatpush3.msra.mxu1 %v584_v1 }
  0xfc   : > { %1009 = vmatprep.subr.mxu1 %v583_v2 }
  0xfd   : > { %1025 = vmatpush3.msra.mxu1 %v583_v2 }
  0xfe   : > { %1010 = vmatprep.subr.mxu1 %v582_v3 }
  0xff   : > { %1026 = vmatpush3.msra.mxu1 %v582_v3 }
 0x100   : > { %1011 = vmatprep.subr.mxu1 %v581_v4 }
 0x101   : > { %1027 = vmatpush3.msra.mxu1 %v581_v4 }
 0x102   : > { %1012 = vmatprep.subr.mxu1 %v580_v5 }
 0x103   : > { %1028 = vmatpush3.msra.mxu1 %v580_v5 }
 0x104   : > { %1013 = vmatprep.subr.mxu1 %v579_v25 }
 0x105   : > { %1029 = vmatpush3.msra.mxu1 %v579_v25 }
 0x106   : > { %1014 = vmatprep.subr.mxu1 %v578_v26 }
 0x107   : > { %1030 = vmatpush3.msra.mxu1 %v578_v26 }
 0x108   : > { %1015 = vmatprep.subr.mxu1 %v577_v27 }
 0x109   : > { %1031 = vmatpush3.msra.mxu1 %v577_v27 }
 0x10a   : > { %1016 = vmatprep.subr.mxu1 %v576_v28 }
 0x10b   : > { %1032 = vmatpush3.msra.mxu1 %v576_v28 }
 0x1ac   : > { %v912_v7 = vpop.f32.mrf.mxu1 }
 0x1ad   : > { %v420_v8 = vadd.f32 %v912_v7, %v787_v6 }
 0x1ae   : > { %v414_v9 = vpop.f32.mrf.mxu1 }
 0x1af   : > { %v415_v10 = vadd.f32 %v787_v6, %v414_v9  ;;  %v444_v13 = vmax.f32 %v420_v8, 0.0 }
 0x1b0   : > { %v915_v11 = vpop.f32.mrf.mxu1 }
 0x1b1   : > { %v443_v12 = vmax.f32 %v415_v10, 0.0  ;;  %v430_v14 = vadd.f32 %v915_v11, %v787_v6 }
 0x1b2   : > { %v424_v15 = vpop.f32.mrf.mxu1 }
 0x1b3   : > { %v425_v16 = vadd.f32 %v787_v6, %v424_v15  ;;  %951 = vmatprep.mubr.f32.mxu0 %v443_v12  ;;  %v446_v19 = vmax.f32 %v430_v14, 0.0 }
 0x1b4   : > { %v918_v17 = vpop.f32.mrf.mxu1  ;;  %952 = vmatmul.mubr.f32.vlgmr.msra.gmra.mxu0 %v444_v13 }
 0x1b5   : > { %v445_v18 = vmax.f32 %v425_v16, 0.0  ;;  %961 = vmatpush3.msra.mxu0 %v591_v58  ;;  %v440_v20 = vadd.f32 %v918_v17, %v787_v6 }
 0x1b6   : > { %v434_v21 = vpop.f32.mrf.mxu1  ;;  %962 = vmatprep.subr.mxu0 %v590_v59 }
 0x1b7   : > { %v435_v22 = vadd.f32 %v787_v6, %v434_v21  ;;  %954 = vmatprep.mubr.f32.mxu0 %v445_v18  ;;  %963 = vmatpush3.msra.mxu0 %v590_v59  ;;  %v448_v24 = vmax.f32 %v440_v20, 0.0 }
 0x1b8   : > { %955 = vmatmul.mubr.f32.gmra.mxu0 %v446_v19  ;;  %964 = vmatprep.subr.mxu0 %v589_v60 }
 0x1b9   : > { %v447_v23 = vmax.f32 %v435_v22, 0.0  ;;  %965 = vmatpush3.msra.mxu0 %v589_v60 }
 0x1ba   : > { %966 = vmatprep.subr.mxu0 %v588_v61 }
 0x1bb   : > { %957 = vmatprep.mubr.f32.mxu0 %v447_v23  ;;  %967 = vmatpush3.msra.mxu0 %v588_v61 }
 0x1bc   : > { %958 = vmatmul.mubr.f32.gmra.mxu0 %v448_v24  ;;  %968 = vmatprep.subr.mxu0 %v587_v62 }
 0x1bd   : > { %969 = vmatpush3.msra.mxu0 %v587_v62 }
 0x1be   : > { %970 = vmatprep.subr.mxu0 %v586_v63 }
 0x1bf   : > { %971 = vmatpush3.msra.mxu0 %v586_v63 }
 0x1c0   : > { %972 = vmatprep.subr.mxu0 %v585_v0 }
 0x1c1   : > { %973 = vmatpush3.msra.mxu0 %v585_v0 }
 0x1c2   : > { %974 = vmatprep.subr.mxu0 %v584_v1 }
 0x1c3   : > { %975 = vmatpush3.msra.mxu0 %v584_v1 }
 0x1c4   : > { %976 = vmatprep.subr.mxu0 %v583_v2 }
 0x1c5   : > { %977 = vmatpush3.msra.mxu0 %v583_v2 }
 0x1c6   : > { %978 = vmatprep.subr.mxu0 %v582_v3 }
 0x1c7   : > { %979 = vmatpush3.msra.mxu0 %v582_v3 }
 0x1c8   : > { %980 = vmatprep.subr.mxu0 %v581_v4 }
 0x1c9   : > { %981 = vmatpush3.msra.mxu0 %v581_v4 }
 0x1ca   : > { %982 = vmatprep.subr.mxu0 %v580_v5 }
 0x1cb   : > { %983 = vmatpush3.msra.mxu0 %v580_v5 }
 0x1cc   : > { %984 = vmatprep.subr.mxu0 %v579_v25 }
 0x1cd   : > { %985 = vmatpush3.msra.mxu0 %v579_v25 }
 0x1ce   : > { %986 = vmatprep.subr.mxu0 %v578_v26 }
 0x1cf   : > { %987 = vmatpush3.msra.mxu0 %v578_v26 }
 0x1d0   : > { %988 = vmatprep.subr.mxu0 %v577_v27 }
 0x1d1   : > { %989 = vmatpush3.msra.mxu0 %v577_v27 }
 0x1d2   : > { %990 = vmatprep.subr.mxu0 %v576_v28 }
 0x1d3   : > { %991 = vmatpush3.msra.mxu0 %v576_v28 }
 0x274   : > { %v953_v30 = vpop.f32.mrf.mxu0 }
 0x275   : > { %v546_v31 = vadd.f32 %v953_v30, %v789_v29 }
 0x276   : > { %v540_v32 = vpop.f32.mrf.mxu0 }
 0x277   : > { %v541_v33 = vadd.f32 %v789_v29, %v540_v32  ;;  %v570_v36 = vmax.f32 %v546_v31, 0.0 }
 0x278   : > { %v956_v34 = vpop.f32.mrf.mxu0 }
 0x279   : > { %v569_v35 = vmax.f32 %v541_v33, 0.0  ;;  %v556_v37 = vadd.f32 %v956_v34, %v789_v29 }
 0x27a   : > { %v550_v38 = vpop.f32.mrf.mxu0 }
 0x27b   : > { %v551_v39 = vadd.f32 %v789_v29, %v550_v38  ;;  %992 = vmatprep.mubr.f32.mxu0 %v569_v35  ;;  %v572_v42 = vmax.f32 %v556_v37, 0.0 }
 0x27c   : > { %v959_v40 = vpop.f32.mrf.mxu0  ;;  %993 = vmatmul.mubr.f32.vlgmr.msra.gmra.mxu0 %v570_v36 }
 0x27d   : > { %v571_v41 = vmax.f32 %v551_v39, 0.0  ;;  %v566_v43 = vadd.f32 %v959_v40, %v789_v29 }
 0x27e   : > { %v560_v44 = vpop.f32.mrf.mxu0 }
 0x27f   : > { %v561_v45 = vadd.f32 %v789_v29, %v560_v44  ;;  %995 = vmatprep.mubr.f32.mxu1 %v571_v41  ;;  %v574_v47 = vmax.f32 %v566_v43, 0.0 }
 0x280   : > { %996 = vmatmul.mubr.f32.vlgmr.msra.gmra.mxu1 %v572_v42 }
 0x281   : > { %v573_v46 = vmax.f32 %v561_v45, 0.0 }
 0x283   : > { %998 = vmatprep.mubr.f32.mxu1 %v573_v46 }
 0x284   : > { %999 = vmatmul.mubr.f32.gmra.mxu1 %v574_v47 }
 0x33c   : > { %v994_v49 = vpop.f32.mrf.mxu0 }
 0x33d   : > { %v672_v50 = vadd.f32 %v994_v49, %v791_v48 }
 0x33e   : > { %v666_v51 = vpop.f32.mrf.mxu0 }
 0x33f   : > { %697 = vst.msk [vmem:[%s187_s11 + $0x8] sm:$0xff] %vm695_vm1, %v672_v50  ;;  %v667_v52 = vadd.f32 %v791_v48, %v666_v51 }
 0x340   : > { %v997_v53 = vpop.f32.mrf.mxu1 }
 0x341   : > { %696 = vst.msk [vmem:[%s187_s11] sm:$0xff] %vm695_vm1, %v667_v52  ;;  %v682_v54 = vadd.f32 %v997_v53, %v791_v48 }
 0x342   : > { %v676_v55 = vpop.f32.mrf.mxu1 }
 0x343   : > { %699 = vst.msk [vmem:[%s187_s11 + $0x18] sm:$0xff] %vm695_vm1, %v682_v54  ;;  %v677_v56 = vadd.f32 %v791_v48, %v676_v55 }
 0x344   : > { %v1000_v57 = vpop.f32.mrf.mxu1 }
 0x345   : > { %698 = vst.msk [vmem:[%s187_s11 + $0x10] sm:$0xff] %vm695_vm1, %v677_v56  ;;  %v692_v58 = vadd.f32 %v1000_v57, %v791_v48 }
 0x346   : > { %v686_v59 = vpop.f32.mrf.mxu1 }
 0x347   : > { %701 = vst.msk [vmem:[%s187_s11 + $0x28] sm:$0xff] %vm695_vm1, %v692_v58  ;;  %v687_v60 = vadd.f32 %v791_v48, %v686_v59 }
 0x349   : > { %700 = vst.msk [vmem:[%s187_s11 + $0x20] sm:$0xff] %vm695_vm1, %v687_v60 }
 0x34a PF: > { %s14_s12 = sadd.s32 1, %s1090_s12  }
 0x34b   : > { %p11_p1 = scmp.ge.s32.totalorder %s14_s12, 4  }
 0x34d   :  { %13 = sbr.rel (!%p11_p1) target bundleno = 1 (0x1), region = 73 }
 0x352   :  { %724 = vsyncpa [#allocation3], 1 }
 0x353   :  { %726 = vsyncpa [#allocation3 + $0x1], 1 }

</bundles_post_ra>
